<compile_context>
chip_gen: v6e
topology: v6e:2x2x1
jax: 0.10.0
libtpu: 0.0.40
codegen_flags: <defaults>
</compile_context>

<pallas_src>
import jax
import jax.numpy as jnp
from jax.experimental import pallas as pl
from jax.experimental.pallas import tpu as pltpu


def _ffn_kernel(xt_ref, w_ref, b_ref, ot_ref):
    # xt_ref: (K=2, TB)  activations, batch on the lane axis (lane-dense)
    # w_ref : (C, 2)     weight in native PyTorch layout, resident across the grid
    # b_ref : (C, 1)     bias column, resident across the grid
    # ot_ref: (C, TB)    lane-dense output tile
    x = xt_ref[...].astype(jnp.float32)
    w = w_ref[...].astype(jnp.float32)
    b = b_ref[...].astype(jnp.float32)
    # Two VPU broadcast-FMAs instead of a 2-deep MXU contraction:
    #   (C,1)*(1,TB) + (C,1)*(1,TB) + (C,1)  ->  (C,TB)
    acc = w[:, 0:1] * x[0:1, :] + w[:, 1:2] * x[1:2, :] + b
    ot_ref[...] = acc.astype(ot_ref.dtype)


def minimal_feed_forward(x, weight, bias, *, block_b=8192):
    """x: (B, 2) ; weight: (num_classes, 2) ; bias: (num_classes,) -> (B, num_classes)."""
    B, K = x.shape
    C, Kw = weight.shape
    assert K == 2 and Kw == K and bias.shape == (C,), "module is nn.Linear(2, C)"

    out_dtype = jnp.result_type(x.dtype, weight.dtype)

    # Lane-dense presentation for the kernel (batch on the last / 128-lane axis).
    xt = x.T                  # (K, B)  -- tiny fused transpose under jit
    b2 = bias.reshape(C, 1)   # (C, 1)

    if B <= block_b:
        # Single block equal to the full array dims (bypasses the 8/128 rule, no padding).
        TB = B
    else:
        # block_b is a multiple of 128 -> lane dim of every non-edge block is aligned;
        # Pallas masks the ragged last block, so no jnp.pad / slice round-trip is needed.
        TB = block_b
    grid = (pl.cdiv(B, TB),)

    out_t = pl.pallas_call(
        _ffn_kernel,
        out_shape=jax.ShapeDtypeStruct((C, B), out_dtype),
        grid_spec=pltpu.PrefetchScalarGridSpec(
            num_scalar_prefetch=0,
            grid=grid,
            in_specs=[
                pl.BlockSpec((K, TB), lambda i: (0, i)),   # batch-tiled, lane-dense
                pl.BlockSpec((C, K), lambda i: (0, 0)),    # resident weight (native layout)
                pl.BlockSpec((C, 1), lambda i: (0, 0)),    # resident bias column
            ],
            out_specs=pl.BlockSpec((C, TB), lambda i: (0, i)),
        ),
        compiler_params=pltpu.CompilerParams(
            # Independent batch tiles -> megacore sharding on v7x when grid >= 2.
            dimension_semantics=("parallel",),
        ),
    )(xt, weight, b2)

    # Back to the module's (B, C) interface; keep (C, B) in a fused consumer if possible.
    return out_t.T


# jit the wrapper so the tiny transposes / reshape fuse with the pallas call.
minimal_feed_forward_jit = jax.jit(minimal_feed_forward, static_argnames=("block_b",))


if __name__ == "__main__":
    num_classes = 3
    in_features = 2  # fixed by the module: nn.Linear(2, num_classes)

    key = jax.random.PRNGKey(0)
    kx, kw, kb, kx2 = jax.random.split(key, 4)

    # PyTorch-style uniform(-1/sqrt(fan_in), +1/sqrt(fan_in)) init.
    bound = 1.0 / jnp.sqrt(in_features)
    weight = jax.random.uniform(kw, (num_classes, in_features),
                                minval=-bound, maxval=bound, dtype=jnp.float32)
    bias = jax.random.uniform(kb, (num_classes,),
                              minval=-bound, maxval=bound, dtype=jnp.float32)

    # Small-batch path: single full-array block, grid = 1, no padding anywhere.
    batch = 8
    x = jax.random.normal(kx, (batch, in_features), dtype=jnp.float32)
    out = jax.block_until_ready(minimal_feed_forward_jit(x, weight, bias))
    ref = x @ weight.T + bias
    assert out.shape == (batch, num_classes)
    assert jnp.allclose(out, ref, atol=1e-5, rtol=1e-5)

    # Multi-tile path with a ragged last block (grid = 3, last tile partial),
    # using a small block_b override to keep the test shapes tiny.
    big_batch = 700
    x2 = jax.random.normal(kx2, (big_batch, in_features), dtype=jnp.float32)
    out2 = jax.block_until_ready(minimal_feed_forward_jit(x2, weight, bias, block_b=256))
    ref2 = x2 @ weight.T + bias
    assert out2.shape == (big_batch, num_classes)
    assert jnp.allclose(out2, ref2, atol=1e-5, rtol=1e-5)

    print("KERNEL_OK")
</pallas_src>

<mosaic_0001>
module attributes {stable_mosaic.version = 11 : i64} {
  func.func @_ffn_kernel(%arg0: i32, %arg1: memref<2x8xf32, #tpu.memory_space<vmem>>, %arg2: memref<3x2xf32, #tpu.memory_space<vmem>>, %arg3: memref<3x1xf32, #tpu.memory_space<vmem>>, %arg4: memref<3x8xf32, #tpu.memory_space<vmem>>) attributes {dimension_semantics = [#tpu.dimension_semantics<parallel>], iteration_bounds = array<i64: 1>, scalar_prefetch = 0 : i64, scratch_operands = 0 : i64, tpu.core_type = #tpu.core_type<tc>, window_params = [{transform_indices = @transform_0, window_bounds = array<i64: 2, 8>}, {pipeline_mode = #tpu.pipeline_mode<synchronous>, transform_indices = @transform_1, window_bounds = array<i64: 3, 2>}, {pipeline_mode = #tpu.pipeline_mode<synchronous>, transform_indices = @transform_2, window_bounds = array<i64: 3, 1>}, {transform_indices = @transform_3, window_bounds = array<i64: 3, 8>}]} {
    %c0 = arith.constant 0 : index
    %c0_0 = arith.constant 0 : index
    %0 = vector.load %arg1[%c0, %c0_0] : memref<2x8xf32, #tpu.memory_space<vmem>>, vector<2x8xf32>
    %c0_1 = arith.constant 0 : index
    %c0_2 = arith.constant 0 : index
    %1 = vector.load %arg2[%c0_1, %c0_2] : memref<3x2xf32, #tpu.memory_space<vmem>>, vector<3x2xf32>
    %c0_3 = arith.constant 0 : index
    %c0_4 = arith.constant 0 : index
    %2 = vector.load %arg3[%c0_3, %c0_4] : memref<3x1xf32, #tpu.memory_space<vmem>>, vector<3x1xf32>
    %3 = vector.extract_strided_slice %1 {offsets = [0, 0], sizes = [3, 1], strides = [1, 1]} : vector<3x2xf32> to vector<3x1xf32>
    %4 = vector.extract_strided_slice %0 {offsets = [0, 0], sizes = [1, 8], strides = [1, 1]} : vector<2x8xf32> to vector<1x8xf32>
    %5 = vector.broadcast %3 : vector<3x1xf32> to vector<3x8xf32>
    %6 = vector.broadcast %4 : vector<1x8xf32> to vector<3x8xf32>
    %7 = arith.mulf %5, %6 : vector<3x8xf32>
    %8 = vector.extract_strided_slice %1 {offsets = [0, 1], sizes = [3, 1], strides = [1, 1]} : vector<3x2xf32> to vector<3x1xf32>
    %9 = vector.extract_strided_slice %0 {offsets = [1, 0], sizes = [1, 8], strides = [1, 1]} : vector<2x8xf32> to vector<1x8xf32>
    %10 = vector.broadcast %8 : vector<3x1xf32> to vector<3x8xf32>
    %11 = vector.broadcast %9 : vector<1x8xf32> to vector<3x8xf32>
    %12 = arith.mulf %10, %11 : vector<3x8xf32>
    %13 = arith.addf %7, %12 : vector<3x8xf32>
    %14 = vector.broadcast %2 : vector<3x1xf32> to vector<3x8xf32>
    %15 = arith.addf %13, %14 : vector<3x8xf32>
    %c0_5 = arith.constant 0 : index
    %c0_6 = arith.constant 0 : index
    %16 = vector.load %arg4[%c0_5, %c0_6] : memref<3x8xf32, #tpu.memory_space<vmem>>, vector<3x8xf32>
    tpu.vector_store %arg4[%c0_5, %c0_6], %15 {strides = array<i32>} : memref<3x8xf32, #tpu.memory_space<vmem>>, vector<3x8xf32>,
    return
  }
  func.func @transform_0(%arg0: i32) -> (i32, i32) {
    %c0_i32 = arith.constant 0 : i32
    %c0_i32_0 = arith.constant 0 : i32
    return %c0_i32, %arg0 : i32, i32
  }
  func.func @transform_1(%arg0: i32) -> (i32, i32) {
    %c0_i32 = arith.constant 0 : i32
    %c0_i32_0 = arith.constant 0 : i32
    %c0_i32_1 = arith.constant 0 : i32
    return %c0_i32, %c0_i32_0 : i32, i32
  }
  func.func @transform_2(%arg0: i32) -> (i32, i32) {
    %c0_i32 = arith.constant 0 : i32
    %c0_i32_0 = arith.constant 0 : i32
    %c0_i32_1 = arith.constant 0 : i32
    return %c0_i32, %c0_i32_0 : i32, i32
  }
  func.func @transform_3(%arg0: i32) -> (i32, i32) {
    %c0_i32 = arith.constant 0 : i32
    %c0_i32_0 = arith.constant 0 : i32
    return %c0_i32, %arg0 : i32, i32
  }
}

</mosaic_0001>

<bundles_post_ra>
// kernel: minimal_feed_forward.1
= control target key start
LH: loop header
LB: loop body
LE: loop exit
PB: predicated region body
PF: predicated region fallthrough
CT: control target
= control target key end

     0   :  { %v89_v2 = vmov 0   ;;  %s124_s0 = inlined_call_operand.vmem [shape: f32[2,8], index: 0, kind: input, shape index: {}]   ;;  %s125_s1 = inlined_call_operand.vmem [shape: f32[3,2], index: 1, kind: input, shape index: {}]   ;;  %s126_s2 = inlined_call_operand.vmem [shape: f32[3,1], index: 2, kind: input, shape index: {}]   ;;  %s127_s3 = inlined_call_operand.hbm [shape: f32[3,8], index: 3, kind: output, shape index: {}]  }
   0x1   :  { %v16_v0 = vld [vmem:[%s125_s1] sm:$0x7]  ;;  %63 = vset.pattern.permute.xlu0 %v89_v2  ;;  %65 = vset.pattern.permute.xlu1 %v89_v2 }
   0x2   :  { %v17_v1 = vld [vmem:[%s126_s2] sm:$0x7] }
   0x3   :  { %8 = vsyncpa [#allocation3], 0  ;;  %20 = vperm.xlu0 %63, %v16_v0   ;;  %40 = vperm.xlu1 %65, %v17_v1   ;;  %v90_v3 = vmov 1   ;;  %v23_v4 = vlaneseq  ;;  %v15_v8 = vld [vmem:[%s124_s0] sm:$0x3]  ;;  %s91_s2 = smov [#allocation2]  }
   0x4   :  { %s52_s17 = sshll.u32 %s91_s2, 4  ;;  %vm44_vm0 = vcmask 59392   ;;  %s53_s17 = int_to_ptr.vmem [resolvable:$true] %s52_s17 }
   0x5   :  { %v24_v5 = vshrl.u32 %v23_v4, 7  ;;  %s67_s18 = scalar_lea.vmem %s53_s17, 64  ;;  %p72_p1 = scmp.lt.s32.totalorder %s53_s17, %s53_s17 }
   0x6   :  { %p68_p0 = scmp.ne.s32.totalorder %s53_s17, %s67_s18  ;;  %p73_p2 = scmp.lt.s32.totalorder %s67_s18, %s67_s18 }
   0x7   :  { %64 = vset.pattern.permute.xlu0 %v90_v3  ;;  %v25_v6 = vsub.s32 0, %v24_v5  ;;  %v34_v7 = vsub.s32 1, %v24_v5 }
   0x8   :  { %29 = vperm.xlu0 %64, %v16_v0   ;;  %p74_p3 = por %p73_p2, %p72_p1 }
   0x9   :  { %v26_v10 = vrot.slane %v15_v8, %v25_v6  ;;  %v35_v11 = vrot.slane %v15_v8, %v34_v7 }
   0xa   :  { %p75_p4 = pnand %p74_p3, %p68_p0 }
   0xc   :  { %66 = vset.pattern.permute.xlu0 %v89_v2 }
  0x7e   :  { %v21_v9 = vpop.permute.xlu0 %20  ;;  %v41_v15 = vpop.permute.xlu1 %40 }
  0x7f   :  { %v27_v13 = vmul.f32 %v26_v10, %v21_v9 }
  0x83   :  { %v30_v12 = vpop.permute.xlu0 %29 }
  0x84   :  { %v36_v14 = vmul.f32 %v35_v11, %v30_v12 }
  0x86   :  { %v37_v16 = vadd.f32 %v36_v14, %v27_v13 }
  0x88   :  { %v43_v17 = vadd.f32 %v41_v15, %v37_v16 }
  0x8a   :  { %45 = vst.msk [vmem:[#allocation2] sm:$0x7] %vm44_vm0, %v43_v17 }
  0x8b   :  { %78 = shalt.err (!%p75_p4)
}
  0x8c   :  { %55 = dma.vmem_to_hbm [thread:$0]  %s53_s17, 64, %s127_s3, [#allocation3]  }
  0x8d   :  { %87 = dma.done.wait [#allocation3], 64  }
  0x8e   :  { %88 = vsyncadd [#allocation3], 4294967232 }
  0x8f   :  { %59 = vsyncpa [#allocation3], 1 }

</bundles_post_ra>
